<compile_context>
chip_gen: v6e
topology: v6e:2x2x1
jax: 0.10.0
libtpu: 0.0.40
codegen_flags: <defaults>
</compile_context>

<pallas_src>
import functools

import jax
import jax.numpy as jnp
from jax.experimental import pallas as pl
from jax.experimental.pallas import tpu as pltpu


def _round_up(x, m):
    return ((x + m - 1) // m) * m


# ----------------------------- Pallas kernels ------------------------------

def _matmul_bn_kernel(a_ref, b_ref, s_ref, c_ref, o_ref, acc_ref, *, relu):
    k = pl.program_id(2)

    @pl.when(k == 0)
    def _():
        acc_ref[...] = jnp.zeros_like(acc_ref)

    acc_ref[...] += jnp.dot(a_ref[...], b_ref[...],
                            preferred_element_type=jnp.float32)

    @pl.when(k == pl.num_programs(2) - 1)
    def _():
        y = acc_ref[...] * s_ref[...] + c_ref[...]
        if relu:
            y = jnp.maximum(y, 0.0)
        o_ref[...] = y.astype(o_ref.dtype)


def _matmul_bn_res_kernel(a_ref, b_ref, s_ref, c_ref, r_ref, o_ref, acc_ref,
                          *, relu):
    k = pl.program_id(2)

    @pl.when(k == 0)
    def _():
        acc_ref[...] = jnp.zeros_like(acc_ref)

    acc_ref[...] += jnp.dot(a_ref[...], b_ref[...],
                            preferred_element_type=jnp.float32)

    @pl.when(k == pl.num_programs(2) - 1)
    def _():
        y = (acc_ref[...] * s_ref[...] + c_ref[...]
             + r_ref[...].astype(jnp.float32))
        if relu:
            y = jnp.maximum(y, 0.0)
        o_ref[...] = y.astype(o_ref.dtype)


def _maxpool_kernel(p00_ref, p01_ref, p10_ref, p11_ref, o_ref, *, ho, wo):
    """3x3 stride-2 max over the 2x2-phase decomposition of the padded input.

    p[a][b] = xpad[:, a::2, b::2, :], each (1, ho+1, wo+1, C); all 9 taps are
    unit-stride static slices -> single pass, no strided loads.
    """
    m = p00_ref[0, 0:ho, 0:wo, :]
    for t in (
        p00_ref[0, 0:ho, 1:wo + 1, :],
        p00_ref[0, 1:ho + 1, 0:wo, :],
        p00_ref[0, 1:ho + 1, 1:wo + 1, :],
        p01_ref[0, 0:ho, 0:wo, :],
        p01_ref[0, 1:ho + 1, 0:wo, :],
        p10_ref[0, 0:ho, 0:wo, :],
        p10_ref[0, 0:ho, 1:wo + 1, :],
        p11_ref[0, 0:ho, 0:wo, :],
    ):
        m = jnp.maximum(m, t)
    o_ref[0] = m


def _mean_axis1_kernel(x_ref, o_ref, *, inv):
    o_ref[...] = (jnp.sum(x_ref[...].astype(jnp.float32), axis=1) * inv
                  ).astype(o_ref.dtype)


# --------------------------- Pallas call wrappers ---------------------------

def matmul_bn_act(a, w, scale, bias, *, relu, residual=None,
                  out_dtype=jnp.bfloat16, n_out=None):
    """y = act((a @ w) * scale + bias [+ residual]).

    a: (M, K); w: (K, Np) bf16 pre-packed (Np % 128 == 0); scale/bias (1, Np).
    Ragged M handled by cdiv grid (masked edge stores) -> no M pad/slice copies.
    """
    M, K = a.shape
    Kw, Np = w.shape
    assert K == Kw and Np % 128 == 0

    a = a.astype(jnp.bfloat16)
    Mp = _round_up(M, 8)
    if Mp != M:                              # rare, tiny (only the FC, M=2)
        a = jnp.pad(a, ((0, Mp - M), (0, 0)))
    r = None
    if residual is not None:
        r = residual.astype(jnp.bfloat16)
        assert r.shape == (M, Np)
        if Mp != M:
            r = jnp.pad(r, ((0, Mp - M), (0, 0)))

    # ---- tile selection (VMEM-aware; worst case ~12 MiB double-buffered) ----
    if Mp >= 1024:
        bm = 512
    elif Mp >= 256:
        bm = 256
    elif Mp >= 128:
        bm = 128
    else:
        bm = Mp                              # single full-M block for tiny M
    bn = 512 if Np >= 512 else Np
    if K <= 2304:
        bk = K                               # full K: no reduction restreaming
    else:
        bk = K
        for cand in (2304, 2048, 1536, 1152, 1024, 768, 512, 384, 256, 128):
            if K % cand == 0:
                bk = cand
                break
    assert K % bk == 0
    gm = -(-Mp // bm)
    gn = Np // bn
    # v7x has 2 TensorCores sharding the parallel axes: keep >=2 blocks.
    if gm * gn < 2 and Np >= 256:
        bn = Np // 2
        gn = 2
    nk = K // bk

    in_specs = [
        pl.BlockSpec((bm, bk), lambda i, j, k: (i, k)),
        pl.BlockSpec((bk, bn), lambda i, j, k: (k, j)),
        pl.BlockSpec((1, bn), lambda i, j, k: (0, j)),
        pl.BlockSpec((1, bn), lambda i, j, k: (0, j)),
    ]
    args = [a, w, scale, bias]
    if r is not None:
        in_specs.append(pl.BlockSpec((bm, bn), lambda i, j, k: (i, j)))
        args.append(r)
        kernel = functools.partial(_matmul_bn_res_kernel, relu=relu)
    else:
        kernel = functools.partial(_matmul_bn_kernel, relu=relu)

    out_bytes = jnp.dtype(out_dtype).itemsize
    cost = pl.CostEstimate(
        flops=2 * gm * bm * K * Np,
        transcendentals=0,
        bytes_accessed=int(Mp * K * 2 + K * Np * 2 + Mp * Np * out_bytes
                           + (Mp * Np * 2 if r is not None else 0)),
    )

    out = pl.pallas_call(
        kernel,
        out_shape=jax.ShapeDtypeStruct((Mp, Np), out_dtype),
        grid=(gm, gn, nk),
        in_specs=in_specs,
        out_specs=pl.BlockSpec((bm, bn), lambda i, j, k: (i, j)),
        scratch_shapes=[pltpu.VMEM((bm, bn), jnp.float32)],
        compiler_params=pltpu.CompilerParams(
            dimension_semantics=("parallel", "parallel", "arbitrary"),
            vmem_limit_bytes=48 * 1024 * 1024),
        cost_estimate=cost,
    )(*args)

    if Mp != M:
        out = out[:M]
    if n_out is not None and n_out != Np:
        out = out[:, :n_out]
    return out


def im2col(x, kh, kw, stride, pad):
    """NHWC -> (N*Ho*Wo, kh*kw*C); K ordered (dy, dx, c) -> single concat only.

    TODO(synk): replace with in-kernel tap accumulation (manual DMA of
    overlapping row bands) to avoid the kh*kw activation expansion in HBM.
    """
    N, H, W, C = x.shape
    Ho = (H + 2 * pad - kh) // stride + 1
    Wo = (W + 2 * pad - kw) // stride + 1
    xp = jnp.pad(x, ((0, 0), (pad, pad), (pad, pad), (0, 0))) if pad else x
    M = N * Ho * Wo
    cols = [xp[:, dy:dy + stride * Ho:stride,
               dx:dx + stride * Wo:stride, :].reshape(M, C)
            for dy in range(kh) for dx in range(kw)]
    a = cols[0] if len(cols) == 1 else jnp.concatenate(cols, axis=-1)
    return a, (N, Ho, Wo)


def conv_bn_act(x, pack, *, stride, pad, relu, residual=None):
    """x NHWC bf16 (channels padded to pack['cin_pad']); fused matmul+BN+act."""
    kh, kw = pack['kh'], pack['kw']
    assert x.shape[-1] == pack['cin_pad']
    if kh == 1 and kw == 1 and pad == 0:
        xs = x if stride == 1 else x[:, ::stride, ::stride, :]
        N, Ho, Wo, _ = xs.shape
        a = xs.reshape(N * Ho * Wo, pack['cin_pad'])
    else:
        a, (N, Ho, Wo) = im2col(x, kh, kw, stride, pad)
    res2d = (None if residual is None
             else residual.reshape(N * Ho * Wo, pack['cout_pad']))
    y = matmul_bn_act(a, pack['w'], pack['scale'], pack['bias'],
                      relu=relu, residual=res2d, out_dtype=jnp.bfloat16)
    return y.reshape(N, Ho, Wo, pack['cout_pad'])


def maxpool_3x3_s2(x):
    """PyTorch MaxPool2d(kernel_size=3, stride=2, padding=1) on NHWC input."""
    N, H, W, C = x.shape
    assert H % 2 == 0 and W % 2 == 0
    Ho, Wo = H // 2, W // 2
    neg = float(jnp.finfo(x.dtype).min)
    xp = jnp.pad(x, ((0, 0), (1, 1), (1, 1), (0, 0)), constant_values=neg)
    # 2x2 phase decomposition (free-ish XLA slices) so the kernel needs only
    # unit-stride slices; padded channels (zeros) stay >= -inf pads -> still 0.
    p00 = xp[:, 0::2, 0::2, :]
    p01 = xp[:, 0::2, 1::2, :]
    p10 = xp[:, 1::2, 0::2, :]
    p11 = xp[:, 1::2, 1::2, :]
    in_spec = pl.BlockSpec((1, Ho + 1, Wo + 1, C), lambda n: (n, 0, 0, 0))
    return pl.pallas_call(
        functools.partial(_maxpool_kernel, ho=Ho, wo=Wo),
        out_shape=jax.ShapeDtypeStruct((N, Ho, Wo, C), x.dtype),
        grid=(N,),
        in_specs=[in_spec, in_spec, in_spec, in_spec],
        out_specs=pl.BlockSpec((1, Ho, Wo, C), lambda n: (n, 0, 0, 0)),
        compiler_params=pltpu.CompilerParams(
            dimension_semantics=("parallel",)),
    )(p00, p01, p10, p11)


def global_avgpool(x):
    """AdaptiveAvgPool2d((1,1)) + flatten: NHWC -> (N, C) f32."""
    N, H, W, C = x.shape
    assert C % 128 == 0
    bc = 256 if C % 256 == 0 else 128
    xr = x.reshape(N, H * W, C)
    return pl.pallas_call(
        functools.partial(_mean_axis1_kernel, inv=1.0 / (H * W)),
        out_shape=jax.ShapeDtypeStruct((N, C), jnp.float32),
        grid=(C // bc,),
        in_specs=[pl.BlockSpec((N, H * W, bc), lambda j: (0, 0, j))],
        out_specs=pl.BlockSpec((N, bc), lambda j: (0, j)),
        compiler_params=pltpu.CompilerParams(
            dimension_semantics=("parallel",)),
    )(xr)


# ------------------------ deterministic parameter init ----------------------

class KeyGen:
    def __init__(self, seed=0):
        self.key = jax.random.PRNGKey(seed)

    def __call__(self):
        self.key, sub = jax.random.split(self.key)
        return sub


def _conv_params(key, cin, cout, k):
    std = (2.0 / (cin * k * k)) ** 0.5
    return std * jax.random.normal(key, (cout, cin, k, k), jnp.float32)


def _bn_params(key, c, eps=1e-5):
    k1, k2, k3, k4 = jax.random.split(key, 4)
    gamma = 1.0 + 0.1 * jax.random.normal(k1, (c,), jnp.float32)
    beta = 0.1 * jax.random.normal(k2, (c,), jnp.float32)
    mean = 0.1 * jax.random.normal(k3, (c,), jnp.float32)
    var = 1.0 + 0.1 * jax.random.uniform(k4, (c,), jnp.float32)
    scale = gamma / jnp.sqrt(var + eps)      # folded inference-mode BN
    bias = beta - mean * scale
    return scale, bias


def _pack_conv_bn(w, scale, bias, *, cin_pad):
    """One-time repack: torch (Cout,Cin,kh,kw) -> (kh*kw*cin_pad, cout_pad) bf16
    with K flattened in (dy, dx, c) order; cin/cout zero-padded to 128-multiples
    so activations can stay channel-padded end-to-end (no pad/slice copies)."""
    cout, cin, kh, kw = w.shape
    if cin_pad != cin:
        w = jnp.pad(w, ((0, 0), (0, cin_pad - cin), (0, 0), (0, 0)))
    K = kh * kw * cin_pad
    cout_pad = _round_up(cout, 128)
    wmat = jnp.transpose(w, (2, 3, 1, 0)).reshape(K, cout).astype(jnp.bfloat16)
    if cout_pad != cout:
        wmat = jnp.pad(wmat, ((0, 0), (0, cout_pad - cout)))
        scale = jnp.pad(scale, (0, cout_pad - cout))
        bias = jnp.pad(bias, (0, cout_pad - cout))
    return {'w': wmat,
            'scale': scale.astype(jnp.float32).reshape(1, cout_pad),
            'bias': bias.astype(jnp.float32).reshape(1, cout_pad),
            'cout_pad': cout_pad, 'cin_pad': cin_pad, 'kh': kh, 'kw': kw}


def init_resnet50_params(seed=0):
    kg = KeyGen(seed)
    params = {'conv1': _pack_conv_bn(_conv_params(kg(), 3, 64, 7),
                                     *_bn_params(kg(), 64), cin_pad=3)}
    layer_cfg = [(64, 3, 1), (128, 4, 2), (256, 6, 2), (512, 3, 2)]
    inplanes = 64
    layers = []
    for planes, blocks, stride in layer_cfg:
        blocks_p = []
        for b in range(blocks):
            s = stride if b == 0 else 1
            in_pad = _round_up(inplanes, 128)
            mid_pad = _round_up(planes, 128)
            blk = {
                'conv1': _pack_conv_bn(_conv_params(kg(), inplanes, planes, 1),
                                       *_bn_params(kg(), planes),
                                       cin_pad=in_pad),
                'conv2': _pack_conv_bn(_conv_params(kg(), planes, planes, 3),
                                       *_bn_params(kg(), planes),
                                       cin_pad=mid_pad),
                'conv3': _pack_conv_bn(_conv_params(kg(), planes, planes * 4, 1),
                                       *_bn_params(kg(), planes * 4),
                                       cin_pad=mid_pad),
                'stride': s,
            }
            if s != 1 or inplanes != planes * 4:
                blk['down'] = _pack_conv_bn(
                    _conv_params(kg(), inplanes, planes * 4, 1),
                    *_bn_params(kg(), planes * 4), cin_pad=in_pad)
            blocks_p.append(blk)
            inplanes = planes * 4
        layers.append(blocks_p)
    params['layers'] = layers

    fc_w = (1.0 / 2048 ** 0.5) * jax.random.normal(kg(), (1000, 2048),
                                                   jnp.float32)
    fc_b = 0.01 * jax.random.normal(kg(), (1000,), jnp.float32)
    nout, npad = 1000, _round_up(1000, 128)
    params['fc'] = {
        'w': jnp.pad(fc_w.T.astype(jnp.bfloat16), ((0, 0), (0, npad - nout))),
        'scale': jnp.pad(jnp.ones((nout,), jnp.float32),
                         (0, npad - nout)).reshape(1, npad),
        'bias': jnp.pad(fc_b, (0, npad - nout)).reshape(1, npad),
        'n_out': nout,
    }
    return params


# -------------------------------- forward -----------------------------------

def bottleneck(x, blk):
    s = blk['stride']
    identity = x
    out = conv_bn_act(x, blk['conv1'], stride=1, pad=0, relu=True)
    out = conv_bn_act(out, blk['conv2'], stride=s, pad=1, relu=True)
    if 'down' in blk:
        identity = conv_bn_act(x, blk['down'], stride=s, pad=0, relu=False)
    # conv3 + BN + residual add + final ReLU fused in one Pallas kernel
    out = conv_bn_act(out, blk['conv3'], stride=1, pad=0, relu=True,
                      residual=identity)
    return out


def custom_quantized_resnet50_forward(params, x_nchw):
    # QuantStub / DeQuantStub of the prepared (pre-convert) model are
    # observers: numerically identity. Activations kept in bf16 NHWC with
    # channel dims padded to 128 (padded lanes stay exactly zero).
    x = jnp.transpose(x_nchw, (0, 2, 3, 1)).astype(jnp.bfloat16)  # NCHW->NHWC
    x = conv_bn_act(x, params['conv1'], stride=2, pad=3, relu=True)
    x = maxpool_3x3_s2(x)
    for blocks in params['layers']:
        for blk in blocks:
            x = bottleneck(x, blk)
    x = global_avgpool(x)                                         # (N, 2048)
    fc = params['fc']
    logits = matmul_bn_act(x, fc['w'], fc['scale'], fc['bias'],
                           relu=False, out_dtype=jnp.float32,
                           n_out=fc['n_out'])                     # (N, 1000)
    return logits


# ---------------------------------- main -------------------------------------

if __name__ == "__main__":
    key = jax.random.PRNGKey(0)
    x = jax.random.normal(key, (2, 3, 64, 64), jnp.float32)  # small NCHW input
    params = init_resnet50_params(seed=0)
    logits = custom_quantized_resnet50_forward(params, x)
    logits = jax.block_until_ready(logits)
    assert logits.shape == (2, 1000)
    assert bool(jnp.all(jnp.isfinite(logits)))
    print("KERNEL_OK")
</pallas_src>

<mosaic_0001>
module attributes {stable_mosaic.version = 11 : i64} {
  func.func @_matmul_bn_kernel(%arg0: i32, %arg1: i32, %arg2: i32, %arg3: memref<512x147xbf16, #tpu.memory_space<vmem>>, %arg4: memref<147x128xbf16, #tpu.memory_space<vmem>>, %arg5: memref<1x128xf32, #tpu.memory_space<vmem>>, %arg6: memref<1x128xf32, #tpu.memory_space<vmem>>, %arg7: memref<512x128xbf16, #tpu.memory_space<vmem>>, %arg8: memref<512x128xf32, #tpu.memory_space<vmem>>) attributes {dimension_semantics = [#tpu.dimension_semantics<parallel>, #tpu.dimension_semantics<parallel>, #tpu.dimension_semantics<arbitrary>], iteration_bounds = array<i64: 4, 1, 1>, scalar_prefetch = 0 : i64, scratch_operands = 1 : i64, tpu.core_type = #tpu.core_type<tc>, window_params = [{transform_indices = @transform_0, window_bounds = array<i64: 512, 147>}, {transform_indices = @transform_1, window_bounds = array<i64: 147, 128>}, {transform_indices = @transform_2, window_bounds = array<i64: 1, 128>}, {transform_indices = @transform_3, window_bounds = array<i64: 1, 128>}, {transform_indices = @transform_4, window_bounds = array<i64: 512, 128>}]} {
    %c0_i32 = arith.constant 0 : i32
    %0 = arith.cmpi eq, %arg2, %c0_i32 : i32
    %1 = arith.extui %0 : i1 to i32
    %c0_i32_0 = arith.constant 0 : i32
    %2 = arith.cmpi ne, %1, %c0_i32_0 : i32
    scf.if %2 {
      %cst_10 = arith.constant 0.000000e+00 : f32
      %12 = vector.broadcast %cst_10 : f32 to vector<512x128xf32>
      %c0_11 = arith.constant 0 : index
      %c0_12 = arith.constant 0 : index
      %13 = vector.load %arg8[%c0_11, %c0_12] : memref<512x128xf32, #tpu.memory_space<vmem>>, vector<512x128xf32>
      tpu.vector_store %arg8[%c0_11, %c0_12], %12 {strides = array<i32>} : memref<512x128xf32, #tpu.memory_space<vmem>>, vector<512x128xf32>,
    } else {
    }
    %c0 = arith.constant 0 : index
    %c0_1 = arith.constant 0 : index
    %3 = vector.load %arg8[%c0, %c0_1] : memref<512x128xf32, #tpu.memory_space<vmem>>, vector<512x128xf32>
    %c0_2 = arith.constant 0 : index
    %c0_3 = arith.constant 0 : index
    %4 = vector.load %arg3[%c0_2, %c0_3] : memref<512x147xbf16, #tpu.memory_space<vmem>>, vector<512x147xbf16>
    %c0_4 = arith.constant 0 : index
    %c0_5 = arith.constant 0 : index
    %5 = vector.load %arg4[%c0_4, %c0_5] : memref<147x128xbf16, #tpu.memory_space<vmem>>, vector<147x128xbf16>
    %cst = arith.constant dense<0.000000e+00> : vector<512x128xf32>
    %6 = tpu.matmul %4, %5, %cst {dimension_numbers = #tpu.dot_dimension_numbers<[1], [0], [0], [1], [0, 0, 1, 1], [], []>} : vector<512x147xbf16>, vector<147x128xbf16>, vector<512x128xf32> -> vector<512x128xf32>
    %7 = arith.addf %3, %6 : vector<512x128xf32>
    %c0_6 = arith.constant 0 : index
    %c0_7 = arith.constant 0 : index
    %8 = vector.load %arg8[%c0_6, %c0_7] : memref<512x128xf32, #tpu.memory_space<vmem>>, vector<512x128xf32>
    tpu.vector_store %arg8[%c0_6, %c0_7], %7 {strides = array<i32>} : memref<512x128xf32, #tpu.memory_space<vmem>>, vector<512x128xf32>,
    %c0_i32_8 = arith.constant 0 : i32
    %9 = arith.cmpi eq, %arg2, %c0_i32_8 : i32
    %10 = arith.extui %9 : i1 to i32
    %c0_i32_9 = arith.constant 0 : i32
    %11 = arith.cmpi ne, %10, %c0_i32_9 : i32
    scf.if %11 {
      %c0_10 = arith.constant 0 : index
      %c0_11 = arith.constant 0 : index
      %12 = vector.load %arg8[%c0_10, %c0_11] : memref<512x128xf32, #tpu.memory_space<vmem>>, vector<512x128xf32>
      %c0_12 = arith.constant 0 : index
      %c0_13 = arith.constant 0 : index
      %13 = vector.load %arg5[%c0_12, %c0_13] : memref<1x128xf32, #tpu.memory_space<vmem>>, vector<1x128xf32>
      %14 = vector.broadcast %13 : vector<1x128xf32> to vector<512x128xf32>
      %15 = arith.mulf %12, %14 : vector<512x128xf32>
      %c0_14 = arith.constant 0 : index
      %c0_15 = arith.constant 0 : index
      %16 = vector.load %arg6[%c0_14, %c0_15] : memref<1x128xf32, #tpu.memory_space<vmem>>, vector<1x128xf32>
      %17 = vector.broadcast %16 : vector<1x128xf32> to vector<512x128xf32>
      %18 = arith.addf %15, %17 : vector<512x128xf32>
      %cst_16 = arith.constant 0.000000e+00 : f32
      %19 = vector.broadcast %cst_16 : f32 to vector<512x128xf32>
      %20 = arith.maximumf %18, %19 : vector<512x128xf32>
      %21 = arith.truncf %20 : vector<512x128xf32> to vector<512x128xbf16>
      %c0_17 = arith.constant 0 : index
      %c0_18 = arith.constant 0 : index
      %22 = vector.load %arg7[%c0_17, %c0_18] : memref<512x128xbf16, #tpu.memory_space<vmem>>, vector<512x128xbf16>
      tpu.vector_store %arg7[%c0_17, %c0_18], %21 {strides = array<i32>} : memref<512x128xbf16, #tpu.memory_space<vmem>>, vector<512x128xbf16>,
    } else {
    }
    return
  }
  func.func @transform_0(%arg0: i32, %arg1: i32, %arg2: i32) -> (i32, i32) {
    %c0_i32 = arith.constant 0 : i32
    return %arg0, %arg2 : i32, i32
  }
  func.func @transform_1(%arg0: i32, %arg1: i32, %arg2: i32) -> (i32, i32) {
    %c0_i32 = arith.constant 0 : i32
    return %arg2, %arg1 : i32, i32
  }
  func.func @transform_2(%arg0: i32, %arg1: i32, %arg2: i32) -> (i32, i32) {
    %c0_i32 = arith.constant 0 : i32
    %c0_i32_0 = arith.constant 0 : i32
    return %c0_i32, %arg1 : i32, i32
  }
  func.func @transform_3(%arg0: i32, %arg1: i32, %arg2: i32) -> (i32, i32) {
    %c0_i32 = arith.constant 0 : i32
    %c0_i32_0 = arith.constant 0 : i32
    return %c0_i32, %arg1 : i32, i32
  }
  func.func @transform_4(%arg0: i32, %arg1: i32, %arg2: i32) -> (i32, i32) {
    %c0_i32 = arith.constant 0 : i32
    return %arg0, %arg1 : i32, i32
  }
}

</mosaic_0001>

<bundles_post_ra>
// kernel: tpu_custom_call.1
= control target key start
LH: loop header
LB: loop body
LE: loop exit
PB: predicated region body
PF: predicated region fallthrough
CT: control target
= control target key end

     0   :  { %9 = vsyncpa [#allocation4], 0  ;;  %s3270_s0 = inlined_call_operand.vmem [shape: bf16[2048,147], index: 0, kind: input, shape index: {}]   ;;  %s3271_s1 = inlined_call_operand.vmem [shape: bf16[147,128], index: 1, kind: input, shape index: {}]   ;;  %s3272_s2 = inlined_call_operand.vmem [shape: f32[1,128], index: 2, kind: input, shape index: {}]   ;;  %s3273_s3 = inlined_call_operand.vmem [shape: f32[1,128], index: 3, kind: input, shape index: {}]   ;;  %s3274_s4 = inlined_call_operand.hbm [shape: bf16[2048,128], index: 4, kind: output, shape index: {}]  }
   0x1   :  { %11 = vsyncpa [#allocation4 + $0x1], 0  ;;  %s2852_s15 = smov 0   ;;  %s2854_s16 = smov 0  }
   0x2   :  { %s2856_s17 = smov 0   ;;  %s2858_s18 = smov 0  }
   0x3   :  { %s2860_s19 = smov 0   ;;  %s2862_s20 = smov 0  }
   0x4 LB: > { %s2113_s21 = sadd.s32 4294967295, %s2820_s20   ;;  %s2114_s22 = sadd.s32 4294967294, %s2820_s20   ;;  %s2820_s20 = sphi %s2862_s20, %s17_s20   ;;  %s2816_s19 = sphi %s2860_s19, %s3281_s19   ;;  %s2812_s18 = sphi %s2858_s18, %s3280_s18   ;;  %s2808_s17 = sphi %s2856_s17, %s3279_s17   ;;  %s2804_s16 = sphi %s2854_s16, %s3278_s16   ;;  %s2800_s15 = sphi %s2852_s15, %s3277_s15  }
   0x5   : > { %s36_s23 = sadd.s32 1, %s2816_s19  ;;  %s153_s24 = sadd.s32 1, %s2808_s17 }
   0x6   : > { %p38_p0 = scmp.ge.s32.totalorder %s36_s23, 4  ;;  %p163_p1 = scmp.ne.s32.totalorder %s2808_s17, %s2804_s16 }
   0x7   : > { %p164_p2 = scmp.eq.s32.totalorder %s2113_s21, 3  ;;  %p169_p3 = scmp.ne.s32.totalorder %s2804_s16, %s2800_s15 }
   0x8   : > { %s3283_s23 = smov (%p38_p0, %s36_s23), 0  ;;  %p170_p5 = scmp.eq.s32.totalorder %s2114_s22, 3 }
   0x9   : > { %p2892_p4 = por %p164_p2, %p163_p1  ;;  %s148_s26 = ssub.s32 %s2816_s19, %s3283_s23 }
   0xa   : > { %p2120_p6 = scmp.ge.s32.totalorder %s2820_s20, 1  ;;  %p151_p7 = scmp.eq.s32.totalorder %s148_s26, 0 }
   0xb   : > { %p2899_p8 = por %p170_p5, %p169_p3  ;;  %p227_p9 = scmp.lt.s32.totalorder %s2820_s20, 5 }
   0xc   : > { %s2905_s28 = scalar_select %p151_p7, %s2808_s17, %s153_s24  }
   0xd   : > { %p228_p10 = pnand %p2120_p6, %p227_p9 }
   0xe   : > { %s2122_s9 = sshll.u32 (!%p228_p10), %s2812_s18, 6  ;;  %s2367_s29 = sshll.u32 (!%p228_p10), %s2812_s18, 12 }
   0xf   : > { %231 = sbr.rel (%p228_p10) target bundleno = 400 (0x190), region = 36  ;;  %p274_p11 = scmp.lt.s32.totalorder (!%p228_p10), %s2122_s9, 255 }
  0x10   : > { %s3217_s7 = scalar_lea.hbm (!%p228_p10), %s3274_s4, %s2367_s29 }
  0x14   : > { %v2638_v0 = vld [vmem:[%s3271_s1 + $0x38] sm:$0xff]   ;;  %v2822_v1 = vmov 0   ;;  %v2639_v2 = vld [vmem:[%s3271_s1 + $0x30] sm:$0xff]   ;;  %v2640_v3 = vld [vmem:[%s3271_s1 + $0x28] sm:$0xff]   ;;  %s3285_s9 = smov (!%p274_p11, %s2122_s9), 255  ;;  %vm861_vm0 = vcmask 154624  }
  0x15   : > { %965 = vmatprep.subr.bf16.mxu0 %v2822_v1  ;;  %2559 = vmatprep.subr.bf16.mxu1 %v2822_v1  ;;  %v2641_v4 = vld [vmem:[%s3271_s1 + $0x20] sm:$0xff]   ;;  %s2302_s12 = sshll.u32 %s3285_s9, 3  ;;  %v2642_v5 = vld [vmem:[%s3271_s1 + $0x18] sm:$0xff]   ;;  %v2643_v8 = vld [vmem:[%s3271_s1 + $0x10] sm:$0xff]   ;;  %vm958_vm1 = vcmask 1040384   ;;  %vm959_vm2 = vcmask 1041408  }
  0x16   : > { %966 = vmatpush1.bf16.msra.mxu0 %v2638_v0  ;;  %2569 = vmatpush1.bf16.msra.mxu1 %v2638_v0  ;;  %s2923_s21 = scalar_lea.vmem %s3270_s0, %s2302_s12  ;;  %v2644_v9 = vld [vmem:[%s3271_s1 + $0x8] sm:$0xff]   ;;  %v2823_v10 = vmov 65535   ;;  %v2645_v12 = vld [vmem:[%s3271_s1] sm:$0xff]   ;;  %s2824_s9 = smov [#allocation3]  }
  0x17   : > { %967 = vmatprep.subr.bf16.mxu0 %v2822_v1  ;;  %2560 = vmatprep.subr.bf16.mxu1 %v2822_v1  ;;  %v2650_v6 = vld [vmem:[%s2923_s21 + $0x4] ss:$8 sps:$4 sm:$0xff]   ;;  %v960_v11 = vsel %vm958_vm1, 4294967295, %v2823_v10  ;;  %v2646_v13 = vld [vmem:[%s3271_s1 + $0x48] ss:$0 sps:$4 sm:$0x33]  }
  0x18   : > { %v2653_v7 = vld [vmem:[%s2923_s21 + $0x104] ss:$8 sps:$4 sm:$0xff]   ;;  %2199 = vmatprep.mubr.msk.bf16.mxu0 %vm861_vm0, %v2650_v6  ;;  %v961_v14 = vsel %vm959_vm2, %v960_v11, 0  ;;  %v2648_v17 = vld [vmem:[%s2923_s21] ss:$8 sps:$4 sm:$0xff]   ;;  %s2748_s10 = sshll.u32 %s2824_s9, 4  ;;  %s2749_s10 = int_to_ptr.vmem [resolvable:$false] %s2748_s10 }
  0x19   : > { %2215 = vmatprep.mubr.msk.bf16.mxu1 %vm861_vm0, %v2653_v7  ;;  %v963_v15 = vand.u32 %v2646_v13, %v961_v14  ;;  %v2647_v16 = vld [vmem:[%s3271_s1 + $0x40] sm:$0xff]   ;;  %v2654_v19 = vld [vmem:[%s2923_s21 + $0x14] ss:$8 sps:$4 sm:$0xff]   ;;  %v2658_v21 = vld [vmem:[%s2923_s21 + $0x10] ss:$8 sps:$4 sm:$0xff]   ;;  %s2750_s11 = scalar_lea.vmem %s2749_s10, 8192 }
  0x1a   : > { %968 = vmatpush1.bf16.msra.mxu0 %v2639_v2  ;;  %2570 = vmatpush1.bf16.msra.mxu1 %v2639_v2  ;;  %v2651_v18 = vld [vmem:[%s2923_s21 + $0x100] ss:$8 sps:$4 sm:$0xff]   ;;  %v2656_v20 = vld [vmem:[%s2923_s21 + $0x114] ss:$8 sps:$4 sm:$0xff]   ;;  %v2659_v22 = vld [vmem:[%s2923_s21 + $0x110] ss:$8 sps:$4 sm:$0xff]  }
  0x1b   : > { %969 = vmatprep.subr.bf16.mxu0 %v2822_v1  ;;  %2561 = vmatprep.subr.bf16.mxu1 %v2822_v1  ;;  %v2660_v23 = vld [vmem:[%s2923_s21 + $0x24] ss:$8 sps:$4 sm:$0xff]   ;;  %v2664_v25 = vld [vmem:[%s2923_s21 + $0x20] ss:$8 sps:$4 sm:$0xff]   ;;  %v2666_v27 = vld [vmem:[%s2923_s21 + $0x34] ss:$8 sps:$4 sm:$0xff]  }
  0x1c   : > { %v2662_v24 = vld [vmem:[%s2923_s21 + $0x124] ss:$8 sps:$4 sm:$0xff]   ;;  %v2665_v26 = vld [vmem:[%s2923_s21 + $0x120] ss:$8 sps:$4 sm:$0xff]   ;;  %v2668_v28 = vld [vmem:[%s2923_s21 + $0x134] ss:$8 sps:$4 sm:$0xff]  }
  0x1d   : > { %v2670_v29 = vld [vmem:[%s2923_s21 + $0x30] ss:$8 sps:$4 sm:$0xff]   ;;  %v2672_v31 = vld [vmem:[%s2923_s21 + $0x44] ss:$8 sps:$4 sm:$0xff]   ;;  %v2676_v33 = vld [vmem:[%s2923_s21 + $0x40] ss:$8 sps:$4 sm:$0xff]  }
  0x1e   : > { %970 = vmatpush1.bf16.msra.mxu0 %v2640_v3  ;;  %2571 = vmatpush1.bf16.msra.mxu1 %v2640_v3  ;;  %v2671_v30 = vld [vmem:[%s2923_s21 + $0x130] ss:$8 sps:$4 sm:$0xff]   ;;  %v2674_v32 = vld [vmem:[%s2923_s21 + $0x144] ss:$8 sps:$4 sm:$0xff]   ;;  %v2677_v34 = vld [vmem:[%s2923_s21 + $0x140] ss:$8 sps:$4 sm:$0xff]  }
  0x1f   : > { %971 = vmatprep.subr.bf16.mxu0 %v2822_v1  ;;  %2562 = vmatprep.subr.bf16.mxu1 %v2822_v1  ;;  %v2678_v35 = vld [vmem:[%s2923_s21 + $0x54] ss:$8 sps:$4 sm:$0xff]   ;;  %v2682_v37 = vld [vmem:[%s2923_s21 + $0x50] ss:$8 sps:$4 sm:$0xff]   ;;  %v2684_v39 = vld [vmem:[%s2923_s21 + $0x64] ss:$8 sps:$4 sm:$0xff]  }
  0x20   : > { %v2680_v36 = vld [vmem:[%s2923_s21 + $0x154] ss:$8 sps:$4 sm:$0xff]   ;;  %v2683_v38 = vld [vmem:[%s2923_s21 + $0x150] ss:$8 sps:$4 sm:$0xff]   ;;  %v2686_v40 = vld [vmem:[%s2923_s21 + $0x164] ss:$8 sps:$4 sm:$0xff]  }
  0x21   : > { %v2688_v41 = vld [vmem:[%s2923_s21 + $0x60] ss:$8 sps:$4 sm:$0xff]   ;;  %v2690_v43 = vld [vmem:[%s2923_s21 + $0x74] ss:$8 sps:$4 sm:$0xff]   ;;  %v2694_v45 = vld [vmem:[%s2923_s21 + $0x70] ss:$8 sps:$4 sm:$0xff]  }
  0x22   : > { %972 = vmatpush1.bf16.msra.mxu0 %v2641_v4  ;;  %2572 = vmatpush1.bf16.msra.mxu1 %v2641_v4  ;;  %v2689_v42 = vld [vmem:[%s2923_s21 + $0x160] ss:$8 sps:$4 sm:$0xff]   ;;  %v2692_v44 = vld [vmem:[%s2923_s21 + $0x174] ss:$8 sps:$4 sm:$0xff]   ;;  %v2695_v46 = vld [vmem:[%s2923_s21 + $0x170] ss:$8 sps:$4 sm:$0xff]  }
  0x23   : > { %973 = vmatprep.subr.bf16.mxu0 %v2822_v1  ;;  %2563 = vmatprep.subr.bf16.mxu1 %v2822_v1  ;;  %v2696_v47 = vld [vmem:[%s2923_s21 + $0x84] ss:$8 sps:$4 sm:$0xff]   ;;  %v2700_v49 = vld [vmem:[%s2923_s21 + $0x80] ss:$8 sps:$4 sm:$0xff]   ;;  %v2702_v51 = vld [vmem:[%s2923_s21 + $0x94] ss:$8 sps:$4 sm:$0xff]  }
  0x24   : > { %v2698_v48 = vld [vmem:[%s2923_s21 + $0x184] ss:$8 sps:$4 sm:$0xff]   ;;  %v2701_v50 = vld [vmem:[%s2923_s21 + $0x180] ss:$8 sps:$4 sm:$0xff]   ;;  %v2704_v52 = vld [vmem:[%s2923_s21 + $0x194] ss:$8 sps:$4 sm:$0xff]  }
  0x25   : > { %v2706_v53 = vld [vmem:[%s2923_s21 + $0x90] ss:$8 sps:$4 sm:$0xff]   ;;  %v2708_v55 = vld [vmem:[%s2923_s21 + $0xa4] ss:$8 sps:$4 sm:$0xff]   ;;  %v2712_v57 = vld [vmem:[%s2923_s21 + $0xa0] ss:$8 sps:$4 sm:$0xff]  }
  0x26   : > { %974 = vmatpush1.bf16.msra.mxu0 %v2642_v5  ;;  %2573 = vmatpush1.bf16.msra.mxu1 %v2642_v5  ;;  %v2707_v54 = vld [vmem:[%s2923_s21 + $0x190] ss:$8 sps:$4 sm:$0xff]   ;;  %v2710_v56 = vld [vmem:[%s2923_s21 + $0x1a4] ss:$8 sps:$4 sm:$0xff]   ;;  %v2713_v58 = vld [vmem:[%s2923_s21 + $0x1a0] ss:$8 sps:$4 sm:$0xff]  }
  0x27   : > { %975 = vmatprep.subr.bf16.mxu0 %v2822_v1  ;;  %2564 = vmatprep.subr.bf16.mxu1 %v2822_v1  ;;  %v2714_v59 = vld [vmem:[%s2923_s21 + $0xb4] ss:$8 sps:$4 sm:$0xff]   ;;  %v2718_v61 = vld [vmem:[%s2923_s21 + $0xb0] ss:$8 sps:$4 sm:$0xff]   ;;  %v2720_v63 = vld [vmem:[%s2923_s21 + $0xc4] ss:$8 sps:$4 sm:$0xff]  }
  0x28   : > { %v2716_v60 = vld [vmem:[%s2923_s21 + $0x1b4] ss:$8 sps:$4 sm:$0xff]   ;;  %v2719_v62 = vld [vmem:[%s2923_s21 + $0x1b0] ss:$8 sps:$4 sm:$0xff]   ;;  %v2722_v0 = vld [vmem:[%s2923_s21 + $0x1c4] ss:$8 sps:$4 sm:$0xff]  }
  0x29   : > { %v2725_v2 = vld [vmem:[%s2923_s21 + $0x1c0] ss:$8 sps:$4 sm:$0xff]   ;;  %v2726_v3 = vld [vmem:[%s2923_s21 + $0xd4] ss:$8 sps:$4 sm:$0xff]   ;;  %v2730_v5 = vld [vmem:[%s2923_s21 + $0xd0] ss:$8 sps:$4 sm:$0xff]  }
  0x2a   : > { %976 = vmatpush1.bf16.msra.mxu0 %v2643_v8  ;;  %2574 = vmatpush1.bf16.msra.mxu1 %v2643_v8  ;;  %v2728_v4 = vld [vmem:[%s2923_s21 + $0x1d4] ss:$8 sps:$4 sm:$0xff]   ;;  %v2731_v6 = vld [vmem:[%s2923_s21 + $0x1d0] ss:$8 sps:$4 sm:$0xff]   ;;  %v2732_v7 = vld [vmem:[%s2923_s21 + $0xe4] ss:$8 sps:$4 sm:$0xff]  }
  0x2b   : > { %977 = vmatprep.subr.bf16.mxu0 %v2822_v1  ;;  %2565 = vmatprep.subr.bf16.mxu1 %v2822_v1  ;;  %v2734_v8 = vld [vmem:[%s2923_s21 + $0x1e4] ss:$8 sps:$4 sm:$0xff]   ;;  %v2737_v10 = vld [vmem:[%s2923_s21 + $0x1e0] ss:$8 sps:$4 sm:$0xff]   ;;  %v2738_v11 = vld [vmem:[%s2923_s21 + $0xf4] ss:$8 sps:$4 sm:$0xff]  }
  0x2c   : > { %v2742_v13 = vld [vmem:[%s2923_s21 + $0xf0] ss:$8 sps:$4 sm:$0xff]  }
  0x2d   : > { %v2743_v14 = vld [vmem:[%s2923_s21 + $0x1f0] ss:$8 sps:$4 sm:$0xff]  }
  0x2e   : > { %978 = vmatpush1.bf16.msra.mxu0 %v2644_v9  ;;  %2575 = vmatpush1.bf16.msra.mxu1 %v2644_v9  ;;  %v2736_v9 = vld [vmem:[%s2923_s21 + $0xe0] ss:$8 sps:$4 sm:$0xff]  }
  0x2f   : > { %979 = vmatprep.subr.bf16.mxu0 %v2822_v1  ;;  %2566 = vmatprep.subr.bf16.mxu1 %v2822_v1 }
  0x32   : > { %980 = vmatpush1.bf16.msra.mxu0 %v2645_v12  ;;  %2576 = vmatpush1.bf16.msra.mxu1 %v2645_v12  ;;  %v2740_v12 = vld [vmem:[%s2923_s21 + $0x1f4] ss:$8 sps:$4 sm:$0xff]  }
  0x33   : > { %993 = vmatprep.subr.bf16.mxu0 %v2822_v1  ;;  %2567 = vmatprep.subr.bf16.mxu1 %v2822_v1 }
  0x36   : > { %994 = vmatpush2.bf16.msra.mxu0 %v963_v15  ;;  %2577 = vmatpush2.bf16.msra.mxu1 %v963_v15  ;;  %v3042_v15 = vld [vmem:[%s3272_s2] ss:$0 sm:$0xff] }
  0x37   : > { %995 = vmatprep.subr.bf16.mxu0 %v2822_v1  ;;  %2568 = vmatprep.subr.bf16.mxu1 %v2822_v1  ;;  %v2724_v1 = vld [vmem:[%s2923_s21 + $0xc0] ss:$8 sps:$4 sm:$0xff]   ;;  %s269_s21 = sand.u32 1, %s2804_s16  }
  0x38   : > { %s2121_s24 = sshll.u32 %s269_s21, 8  ;;  %s3225_s18 = scalar_lea.sflag [#allocation4], %s269_s21 }
  0x39   : > { %s3064_s26 = scalar_lea.vmem [#allocation3], %s2121_s24 }
  0x3a   : > { %996 = vmatpush2.bf16.msra.mxu0 %v2647_v16  ;;  %2578 = vmatpush2.bf16.msra.mxu1 %v2647_v16  ;;  %s1990_s30 = sshll.u32 %s3064_s26, 4  ;;  %s3219_s30 = int_to_ptr.vmem [resolvable:$true] %s1990_s30 }
  0x3b   : > { %s2744_s8 = scalar_lea.vmem %s3219_s30, 4096  ;;  %p2751_p1 = scmp.lt.s32.totalorder %s3219_s30, %s2749_s10 }
  0x3c   : > { %p2745_p12 = scmp.ne.s32.totalorder %s3219_s30, %s2744_s8  ;;  %p2752_p2 = scmp.lt.s32.totalorder %s2750_s11, %s2744_s8 }
  0x3d   : > { %998 = vmatmul.mubr.bf16.vlgmr.msra.gmra.mxu0 %v2648_v17  ;;  %1126 = vmatmul.mubr.bf16.vlgmr.msra.gmra.mxu1 %v2651_v18 }
  0x3e   : > { %2200 = vmatprep.mubr.msk.bf16.mxu0 %vm861_vm0, %v2654_v19  ;;  %2216 = vmatprep.mubr.msk.bf16.mxu1 %vm861_vm0, %v2656_v20  ;;  %v3048_v19 = vld [vmem:[%s3273_s3] ss:$0 sm:$0xff]  ;;  %p2746_p13 = pnand %p2745_p12, %p2892_p4  ;;  %p2753_p3 = por %p2752_p2, %p2751_p1 }
  0x40   : > { %p2747_p0 = pneg %p2746_p13 }
  0x42   : > { %p2754_p5 = pnand %p2753_p3, %p2747_p0 }
  0x45   : > { %1006 = vmatmul.mubr.bf16.gmra.mxu0 %v2658_v21  ;;  %1134 = vmatmul.mubr.bf16.gmra.mxu1 %v2659_v22 }
  0x46   : > { %2201 = vmatprep.mubr.msk.bf16.mxu0 %vm861_vm0, %v2660_v23  ;;  %2217 = vmatprep.mubr.msk.bf16.mxu1 %vm861_vm0, %v2662_v24 }
  0x4d   : > { %1014 = vmatmul.mubr.bf16.gmra.mxu0 %v2664_v25  ;;  %1142 = vmatmul.mubr.bf16.gmra.mxu1 %v2665_v26 }
  0x4e   : > { %2202 = vmatprep.mubr.msk.bf16.mxu0 %vm861_vm0, %v2666_v27  ;;  %2218 = vmatprep.mubr.msk.bf16.mxu1 %vm861_vm0, %v2668_v28 }
  0x55   : > { %1022 = vmatmul.mubr.bf16.gmra.mxu0 %v2670_v29  ;;  %1150 = vmatmul.mubr.bf16.gmra.mxu1 %v2671_v30 }
  0x56   : > { %2203 = vmatprep.mubr.msk.bf16.mxu0 %vm861_vm0, %v2672_v31  ;;  %2219 = vmatprep.mubr.msk.bf16.mxu1 %vm861_vm0, %v2674_v32 }
  0x5d   : > { %1030 = vmatmul.mubr.bf16.gmra.mxu0 %v2676_v33  ;;  %1158 = vmatmul.mubr.bf16.gmra.mxu1 %v2677_v34 }
  0x5e   : > { %2204 = vmatprep.mubr.msk.bf16.mxu0 %vm861_vm0, %v2678_v35  ;;  %2220 = vmatprep.mubr.msk.bf16.mxu1 %vm861_vm0, %v2680_v36 }
  0x65   : > { %1038 = vmatmul.mubr.bf16.gmra.mxu0 %v2682_v37  ;;  %1166 = vmatmul.mubr.bf16.gmra.mxu1 %v2683_v38 }
  0x66   : > { %2205 = vmatprep.mubr.msk.bf16.mxu0 %vm861_vm0, %v2684_v39  ;;  %2221 = vmatprep.mubr.msk.bf16.mxu1 %vm861_vm0, %v2686_v40 }
  0x6d   : > { %1046 = vmatmul.mubr.bf16.gmra.mxu0 %v2688_v41  ;;  %1174 = vmatmul.mubr.bf16.gmra.mxu1 %v2689_v42 }
  0x6e   : > { %2206 = vmatprep.mubr.msk.bf16.mxu0 %vm861_vm0, %v2690_v43  ;;  %2222 = vmatprep.mubr.msk.bf16.mxu1 %vm861_vm0, %v2692_v44 }
  0x75   : > { %1054 = vmatmul.mubr.bf16.gmra.mxu0 %v2694_v45  ;;  %1182 = vmatmul.mubr.bf16.gmra.mxu1 %v2695_v46 }
  0x76   : > { %2207 = vmatprep.mubr.msk.bf16.mxu0 %vm861_vm0, %v2696_v47  ;;  %2223 = vmatprep.mubr.msk.bf16.mxu1 %vm861_vm0, %v2698_v48 }
  0x7d   : > { %1062 = vmatmul.mubr.bf16.gmra.mxu0 %v2700_v49  ;;  %1190 = vmatmul.mubr.bf16.gmra.mxu1 %v2701_v50 }
  0x7e   : > { %2208 = vmatprep.mubr.msk.bf16.mxu0 %vm861_vm0, %v2702_v51  ;;  %2224 = vmatprep.mubr.msk.bf16.mxu1 %vm861_vm0, %v2704_v52 }
  0x85   : > { %1070 = vmatmul.mubr.bf16.gmra.mxu0 %v2706_v53  ;;  %1198 = vmatmul.mubr.bf16.gmra.mxu1 %v2707_v54 }
  0x86   : > { %2209 = vmatprep.mubr.msk.bf16.mxu0 %vm861_vm0, %v2708_v55  ;;  %2225 = vmatprep.mubr.msk.bf16.mxu1 %vm861_vm0, %v2710_v56 }
  0x8d   : > { %1078 = vmatmul.mubr.bf16.gmra.mxu0 %v2712_v57  ;;  %1206 = vmatmul.mubr.bf16.gmra.mxu1 %v2713_v58 }
  0x8e   : > { %2210 = vmatprep.mubr.msk.bf16.mxu0 %vm861_vm0, %v2714_v59  ;;  %2226 = vmatprep.mubr.msk.bf16.mxu1 %vm861_vm0, %v2716_v60 }
  0x95   : > { %1086 = vmatmul.mubr.bf16.gmra.mxu0 %v2718_v61  ;;  %1214 = vmatmul.mubr.bf16.gmra.mxu1 %v2719_v62 }
  0x96   : > { %2211 = vmatprep.mubr.msk.bf16.mxu0 %vm861_vm0, %v2720_v63  ;;  %2227 = vmatprep.mubr.msk.bf16.mxu1 %vm861_vm0, %v2722_v0 }
  0x9d   : > { %1094 = vmatmul.mubr.bf16.gmra.mxu0 %v2724_v1  ;;  %1222 = vmatmul.mubr.bf16.gmra.mxu1 %v2725_v2 }
  0x9e   : > { %2212 = vmatprep.mubr.msk.bf16.mxu0 %vm861_vm0, %v2726_v3  ;;  %2228 = vmatprep.mubr.msk.bf16.mxu1 %vm861_vm0, %v2728_v4 }
  0xa5   : > { %1102 = vmatmul.mubr.bf16.gmra.mxu0 %v2730_v5  ;;  %1230 = vmatmul.mubr.bf16.gmra.mxu1 %v2731_v6 }
  0xa6   : > { %2213 = vmatprep.mubr.msk.bf16.mxu0 %vm861_vm0, %v2732_v7  ;;  %2229 = vmatprep.mubr.msk.bf16.mxu1 %vm861_vm0, %v2734_v8 }
  0xad   : > { %1110 = vmatmul.mubr.bf16.gmra.mxu0 %v2736_v9  ;;  %1238 = vmatmul.mubr.bf16.gmra.mxu1 %v2737_v10 }
  0xae   : > { %2214 = vmatprep.mubr.msk.bf16.mxu0 %vm861_vm0, %v2738_v11  ;;  %2230 = vmatprep.mubr.msk.bf16.mxu1 %vm861_vm0, %v2740_v12 }
  0xb5   : > { %1118 = vmatmul.mubr.bf16.gmra.mxu0 %v2742_v13  ;;  %1246 = vmatmul.mubr.bf16.gmra.mxu1 %v2743_v14 }
  0xfd   : > { %v999_v16 = vpop.f32.mrf.mxu0  ;;  %v1127_v17 = vpop.f32.mrf.mxu1 }
  0xfe   : > { %v1456_v18 = vmul.f32 %v3042_v15, %v999_v16  ;;  %v1488_v20 = vmul.f32 %v3042_v15, %v1127_v17 }
  0xff   : > { %v1001_v21 = vpop.f32.mrf.mxu0  ;;  %v1129_v22 = vpop.f32.mrf.mxu1 }
 0x100   : > { %v1527_v23 = vadd.f32 %v3048_v19, %v1456_v18  ;;  %v1559_v24 = vadd.f32 %v3048_v19, %v1488_v20 }
 0x101   : > { %v1002_v25 = vpop.f32.mrf.mxu0  ;;  %v1130_v26 = vpop.f32.mrf.mxu1 }
 0x102   : > { %v1457_v27 = vmul.f32 %v3042_v15, %v1002_v25  ;;  %v1489_v28 = vmul.f32 %v3042_v15, %v1130_v26  ;;  %v1591_v33 = vmax.f32 %v1527_v23, 0.0  ;;  %v1623_v34 = vmax.f32 %v1559_v24, 0.0 }
 0x103   : > { %v1004_v29 = vpop.f32.mrf.mxu0  ;;  %v1132_v30 = vpop.f32.mrf.mxu1 }
 0x104   : > { %v1528_v31 = vadd.f32 %v3048_v19, %v1457_v27  ;;  %v1560_v32 = vadd.f32 %v3048_v19, %v1489_v28 }
 0x105   : > { %v1007_v35 = vpop.f32.mrf.mxu0  ;;  %v1135_v36 = vpop.f32.mrf.mxu1 }
 0x106   : > { %v1592_v37 = vmax.f32 %v1528_v31, 0.0  ;;  %v1624_v38 = vmax.f32 %v1560_v32, 0.0  ;;  %v1458_v39 = vmul.f32 %v3042_v15, %v1007_v35  ;;  %v1490_v40 = vmul.f32 %v3042_v15, %v1135_v36 }
 0x107   : > { %v1009_v41 = vpop.f32.mrf.mxu0  ;;  %v1137_v42 = vpop.f32.mrf.mxu1 }
 0x108   : > { %v2371_v43 = vpack.c.bf16 %v1592_v37, %v1591_v33  ;;  %v2451_v44 = vpack.c.bf16 %v1624_v38, %v1623_v34  ;;  %v1529_v45 = vadd.f32 %v3048_v19, %v1458_v39  ;;  %v1561_v46 = vadd.f32 %v3048_v19, %v1490_v40 }
 0x109   : > { %v1010_v47 = vpop.f32.mrf.mxu0  ;;  %v1138_v48 = vpop.f32.mrf.mxu1 }
 0x10a   : > { %2372 = vst [vmem:[%s3064_s26] sm:$0xff] %v2371_v43   ;;  %2543 = vst [vmem:[%s3064_s26 + $0x80] sm:$0xff] %v2451_v44   ;;  %v1459_v49 = vmul.f32 %v3042_v15, %v1010_v47  ;;  %v1491_v50 = vmul.f32 %v3042_v15, %v1138_v48  ;;  %v1593_v55 = vmax.f32 %v1529_v45, 0.0  ;;  %v1625_v56 = vmax.f32 %v1561_v46, 0.0 }
 0x10b   : > { %v1012_v51 = vpop.f32.mrf.mxu0  ;;  %v1140_v52 = vpop.f32.mrf.mxu1 }
 0x10c   : > { %v1530_v53 = vadd.f32 %v3048_v19, %v1459_v49  ;;  %v1562_v54 = vadd.f32 %v3048_v19, %v1491_v50 }
 0x10d   : > { %v1015_v57 = vpop.f32.mrf.mxu0  ;;  %v1143_v58 = vpop.f32.mrf.mxu1 }
 0x10e   : > { %v1594_v59 = vmax.f32 %v1530_v53, 0.0  ;;  %v1626_v60 = vmax.f32 %v1562_v54, 0.0  ;;  %v1460_v61 = vmul.f32 %v3042_v15, %v1015_v57  ;;  %v1492_v62 = vmul.f32 %v3042_v15, %v1143_v58 }
 0x10f   : > { %v1017_v63 = vpop.f32.mrf.mxu0  ;;  %v1145_v0 = vpop.f32.mrf.mxu1 }
 0x110   : > { %v2376_v1 = vpack.c.bf16 %v1594_v59, %v1593_v55  ;;  %v2456_v2 = vpack.c.bf16 %v1626_v60, %v1625_v56  ;;  %v1531_v3 = vadd.f32 %v3048_v19, %v1460_v61  ;;  %v1563_v4 = vadd.f32 %v3048_v19, %v1492_v62 }
 0x111   : > { %v1018_v5 = vpop.f32.mrf.mxu0  ;;  %v1146_v6 = vpop.f32.mrf.mxu1 }
 0x112   : > { %2528 = vst [vmem:[%s3064_s26 + $0x8] sm:$0xff] %v2376_v1   ;;  %2544 = vst [vmem:[%s3064_s26 + $0x88] sm:$0xff] %v2456_v2   ;;  %v1461_v7 = vmul.f32 %v3042_v15, %v1018_v5  ;;  %v1493_v8 = vmul.f32 %v3042_v15, %v1146_v6  ;;  %v1595_v13 = vmax.f32 %v1531_v3, 0.0  ;;  %v1627_v14 = vmax.f32 %v1563_v4, 0.0 }
 0x113   : > { %v1020_v9 = vpop.f32.mrf.mxu0  ;;  %v1148_v10 = vpop.f32.mrf.mxu1 }
 0x114   : > { %v1532_v11 = vadd.f32 %v3048_v19, %v1461_v7  ;;  %v1564_v12 = vadd.f32 %v3048_v19, %v1493_v8 }
 0x115   : > { %v1023_v16 = vpop.f32.mrf.mxu0  ;;  %v1151_v17 = vpop.f32.mrf.mxu1 }
 0x116   : > { %v1596_v18 = vmax.f32 %v1532_v11, 0.0  ;;  %v1628_v20 = vmax.f32 %v1564_v12, 0.0  ;;  %v1462_v21 = vmul.f32 %v3042_v15, %v1023_v16  ;;  %v1494_v22 = vmul.f32 %v3042_v15, %v1151_v17 }
 0x117   : > { %v1025_v23 = vpop.f32.mrf.mxu0  ;;  %v1153_v24 = vpop.f32.mrf.mxu1 }
 0x118   : > { %v2381_v25 = vpack.c.bf16 %v1596_v18, %v1595_v13  ;;  %v2461_v26 = vpack.c.bf16 %v1628_v20, %v1627_v14  ;;  %v1533_v27 = vadd.f32 %v3048_v19, %v1462_v21  ;;  %v1565_v28 = vadd.f32 %v3048_v19, %v1494_v22 }
 0x119   : > { %v1026_v29 = vpop.f32.mrf.mxu0  ;;  %v1154_v30 = vpop.f32.mrf.mxu1 }
 0x11a   : > { %2529 = vst [vmem:[%s3064_s26 + $0x10] sm:$0xff] %v2381_v25   ;;  %2545 = vst [vmem:[%s3064_s26 + $0x90] sm:$0xff] %v2461_v26   ;;  %v1463_v31 = vmul.f32 %v3042_v15, %v1026_v29  ;;  %v1495_v32 = vmul.f32 %v3042_v15, %v1154_v30  ;;  %v1597_v37 = vmax.f32 %v1533_v27, 0.0  ;;  %v1629_v38 = vmax.f32 %v1565_v28, 0.0 }
 0x11b   : > { %v1028_v33 = vpop.f32.mrf.mxu0  ;;  %v1156_v34 = vpop.f32.mrf.mxu1 }
 0x11c   : > { %v1534_v35 = vadd.f32 %v3048_v19, %v1463_v31  ;;  %v1566_v36 = vadd.f32 %v3048_v19, %v1495_v32 }
 0x11d   : > { %v1031_v39 = vpop.f32.mrf.mxu0  ;;  %v1159_v40 = vpop.f32.mrf.mxu1 }
 0x11e   : > { %v1598_v41 = vmax.f32 %v1534_v35, 0.0  ;;  %v1630_v42 = vmax.f32 %v1566_v36, 0.0  ;;  %v1464_v43 = vmul.f32 %v3042_v15, %v1031_v39  ;;  %v1496_v44 = vmul.f32 %v3042_v15, %v1159_v40 }
 0x11f   : > { %v1033_v45 = vpop.f32.mrf.mxu0  ;;  %v1161_v46 = vpop.f32.mrf.mxu1 }
 0x120   : > { %v2386_v47 = vpack.c.bf16 %v1598_v41, %v1597_v37  ;;  %v2466_v48 = vpack.c.bf16 %v1630_v42, %v1629_v38  ;;  %v1535_v49 = vadd.f32 %v3048_v19, %v1464_v43  ;;  %v1567_v50 = vadd.f32 %v3048_v19, %v1496_v44 }
 0x121   : > { %v1034_v51 = vpop.f32.mrf.mxu0  ;;  %v1162_v52 = vpop.f32.mrf.mxu1 }
 0x122   : > { %2530 = vst [vmem:[%s3064_s26 + $0x18] sm:$0xff] %v2386_v47   ;;  %2546 = vst [vmem:[%s3064_s26 + $0x98] sm:$0xff] %v2466_v48   ;;  %v1465_v53 = vmul.f32 %v3042_v15, %v1034_v51  ;;  %v1497_v54 = vmul.f32 %v3042_v15, %v1162_v52  ;;  %v1599_v59 = vmax.f32 %v1535_v49, 0.0  ;;  %v1631_v60 = vmax.f32 %v1567_v50, 0.0 }
 0x123   : > { %v1036_v55 = vpop.f32.mrf.mxu0  ;;  %v1164_v56 = vpop.f32.mrf.mxu1 }
 0x124   : > { %v1536_v57 = vadd.f32 %v3048_v19, %v1465_v53  ;;  %v1568_v58 = vadd.f32 %v3048_v19, %v1497_v54 }
 0x125   : > { %v1039_v61 = vpop.f32.mrf.mxu0  ;;  %v1167_v62 = vpop.f32.mrf.mxu1 }
 0x126   : > { %v1600_v63 = vmax.f32 %v1536_v57, 0.0  ;;  %v1632_v0 = vmax.f32 %v1568_v58, 0.0  ;;  %v1466_v1 = vmul.f32 %v3042_v15, %v1039_v61  ;;  %v1498_v2 = vmul.f32 %v3042_v15, %v1167_v62 }
 0x127   : > { %v1041_v3 = vpop.f32.mrf.mxu0  ;;  %v1169_v4 = vpop.f32.mrf.mxu1 }
 0x128   : > { %v2391_v5 = vpack.c.bf16 %v1600_v63, %v1599_v59  ;;  %v2471_v6 = vpack.c.bf16 %v1632_v0, %v1631_v60  ;;  %v1537_v7 = vadd.f32 %v3048_v19, %v1466_v1  ;;  %v1569_v8 = vadd.f32 %v3048_v19, %v1498_v2 }
 0x129   : > { %v1042_v9 = vpop.f32.mrf.mxu0  ;;  %v1170_v10 = vpop.f32.mrf.mxu1 }
 0x12a   : > { %2531 = vst [vmem:[%s3064_s26 + $0x20] sm:$0xff] %v2391_v5   ;;  %2547 = vst [vmem:[%s3064_s26 + $0xa0] sm:$0xff] %v2471_v6   ;;  %v1467_v11 = vmul.f32 %v3042_v15, %v1042_v9  ;;  %v1499_v12 = vmul.f32 %v3042_v15, %v1170_v10  ;;  %v1601_v18 = vmax.f32 %v1537_v7, 0.0  ;;  %v1633_v20 = vmax.f32 %v1569_v8, 0.0 }
 0x12b   : > { %v1044_v13 = vpop.f32.mrf.mxu0  ;;  %v1172_v14 = vpop.f32.mrf.mxu1 }
 0x12c   : > { %v1538_v16 = vadd.f32 %v3048_v19, %v1467_v11  ;;  %v1570_v17 = vadd.f32 %v3048_v19, %v1499_v12 }
 0x12d   : > { %v1047_v21 = vpop.f32.mrf.mxu0  ;;  %v1175_v22 = vpop.f32.mrf.mxu1 }
 0x12e   : > { %v1602_v23 = vmax.f32 %v1538_v16, 0.0  ;;  %v1634_v24 = vmax.f32 %v1570_v17, 0.0  ;;  %v1468_v25 = vmul.f32 %v3042_v15, %v1047_v21  ;;  %v1500_v26 = vmul.f32 %v3042_v15, %v1175_v22 }
 0x12f   : > { %v1049_v27 = vpop.f32.mrf.mxu0  ;;  %v1177_v28 = vpop.f32.mrf.mxu1 }
 0x130   : > { %v2396_v29 = vpack.c.bf16 %v1602_v23, %v1601_v18  ;;  %v2476_v30 = vpack.c.bf16 %v1634_v24, %v1633_v20  ;;  %v1539_v31 = vadd.f32 %v3048_v19, %v1468_v25  ;;  %v1571_v32 = vadd.f32 %v3048_v19, %v1500_v26 }
 0x131   : > { %v1050_v33 = vpop.f32.mrf.mxu0  ;;  %v1178_v34 = vpop.f32.mrf.mxu1 }
 0x132   : > { %2532 = vst [vmem:[%s3064_s26 + $0x28] sm:$0xff] %v2396_v29   ;;  %2548 = vst [vmem:[%s3064_s26 + $0xa8] sm:$0xff] %v2476_v30   ;;  %v1469_v35 = vmul.f32 %v3042_v15, %v1050_v33  ;;  %v1501_v36 = vmul.f32 %v3042_v15, %v1178_v34  ;;  %v1603_v41 = vmax.f32 %v1539_v31, 0.0  ;;  %v1635_v42 = vmax.f32 %v1571_v32, 0.0 }
 0x133   : > { %v1052_v37 = vpop.f32.mrf.mxu0  ;;  %v1180_v38 = vpop.f32.mrf.mxu1 }
 0x134   : > { %v1540_v39 = vadd.f32 %v3048_v19, %v1469_v35  ;;  %v1572_v40 = vadd.f32 %v3048_v19, %v1501_v36 }
 0x135   : > { %v1055_v43 = vpop.f32.mrf.mxu0  ;;  %v1183_v44 = vpop.f32.mrf.mxu1 }
 0x136   : > { %v1604_v45 = vmax.f32 %v1540_v39, 0.0  ;;  %v1636_v46 = vmax.f32 %v1572_v40, 0.0  ;;  %v1470_v47 = vmul.f32 %v3042_v15, %v1055_v43  ;;  %v1502_v48 = vmul.f32 %v3042_v15, %v1183_v44 }
 0x137   : > { %v1057_v49 = vpop.f32.mrf.mxu0  ;;  %v1185_v50 = vpop.f32.mrf.mxu1 }
 0x138   : > { %v2401_v51 = vpack.c.bf16 %v1604_v45, %v1603_v41  ;;  %v2481_v52 = vpack.c.bf16 %v1636_v46, %v1635_v42  ;;  %v1541_v53 = vadd.f32 %v3048_v19, %v1470_v47  ;;  %v1573_v54 = vadd.f32 %v3048_v19, %v1502_v48 }
 0x139   : > { %v1058_v55 = vpop.f32.mrf.mxu0  ;;  %v1186_v56 = vpop.f32.mrf.mxu1 }
 0x13a   : > { %2533 = vst [vmem:[%s3064_s26 + $0x30] sm:$0xff] %v2401_v51   ;;  %2549 = vst [vmem:[%s3064_s26 + $0xb0] sm:$0xff] %v2481_v52   ;;  %v1471_v57 = vmul.f32 %v3042_v15, %v1058_v55  ;;  %v1503_v58 = vmul.f32 %v3042_v15, %v1186_v56  ;;  %v1605_v63 = vmax.f32 %v1541_v53, 0.0  ;;  %v1637_v0 = vmax.f32 %v1573_v54, 0.0 }
 0x13b   : > { %v1060_v59 = vpop.f32.mrf.mxu0  ;;  %v1188_v60 = vpop.f32.mrf.mxu1 }
 0x13c   : > { %v1542_v61 = vadd.f32 %v3048_v19, %v1471_v57  ;;  %v1574_v62 = vadd.f32 %v3048_v19, %v1503_v58 }
 0x13d   : > { %v1063_v1 = vpop.f32.mrf.mxu0  ;;  %v1191_v2 = vpop.f32.mrf.mxu1 }
 0x13e   : > { %v1606_v3 = vmax.f32 %v1542_v61, 0.0  ;;  %v1638_v4 = vmax.f32 %v1574_v62, 0.0  ;;  %v1472_v5 = vmul.f32 %v3042_v15, %v1063_v1  ;;  %v1504_v6 = vmul.f32 %v3042_v15, %v1191_v2 }
 0x13f   : > { %v1065_v7 = vpop.f32.mrf.mxu0  ;;  %v1193_v8 = vpop.f32.mrf.mxu1 }
 0x140   : > { %v2406_v9 = vpack.c.bf16 %v1606_v3, %v1605_v63  ;;  %v2486_v10 = vpack.c.bf16 %v1638_v4, %v1637_v0  ;;  %v1543_v11 = vadd.f32 %v3048_v19, %v1472_v5  ;;  %v1575_v12 = vadd.f32 %v3048_v19, %v1504_v6 }
 0x141   : > { %v1066_v13 = vpop.f32.mrf.mxu0  ;;  %v1194_v14 = vpop.f32.mrf.mxu1 }
 0x142   : > { %2534 = vst [vmem:[%s3064_s26 + $0x38] sm:$0xff] %v2406_v9   ;;  %2550 = vst [vmem:[%s3064_s26 + $0xb8] sm:$0xff] %v2486_v10   ;;  %v1473_v16 = vmul.f32 %v3042_v15, %v1066_v13  ;;  %v1505_v17 = vmul.f32 %v3042_v15, %v1194_v14  ;;  %v1607_v23 = vmax.f32 %v1543_v11, 0.0  ;;  %v1639_v24 = vmax.f32 %v1575_v12, 0.0 }
 0x143   : > { %v1068_v18 = vpop.f32.mrf.mxu0  ;;  %v1196_v20 = vpop.f32.mrf.mxu1 }
 0x144   : > { %v1544_v21 = vadd.f32 %v3048_v19, %v1473_v16  ;;  %v1576_v22 = vadd.f32 %v3048_v19, %v1505_v17 }
 0x145   : > { %v1071_v25 = vpop.f32.mrf.mxu0  ;;  %v1199_v26 = vpop.f32.mrf.mxu1 }
 0x146   : > { %v1608_v27 = vmax.f32 %v1544_v21, 0.0  ;;  %v1640_v28 = vmax.f32 %v1576_v22, 0.0  ;;  %v1474_v29 = vmul.f32 %v3042_v15, %v1071_v25  ;;  %v1506_v30 = vmul.f32 %v3042_v15, %v1199_v26 }
 0x147   : > { %v1073_v31 = vpop.f32.mrf.mxu0  ;;  %v1201_v32 = vpop.f32.mrf.mxu1 }
 0x148   : > { %v2411_v33 = vpack.c.bf16 %v1608_v27, %v1607_v23  ;;  %v2491_v34 = vpack.c.bf16 %v1640_v28, %v1639_v24  ;;  %v1545_v35 = vadd.f32 %v3048_v19, %v1474_v29  ;;  %v1577_v36 = vadd.f32 %v3048_v19, %v1506_v30 }
 0x149   : > { %v1074_v37 = vpop.f32.mrf.mxu0  ;;  %v1202_v38 = vpop.f32.mrf.mxu1 }
 0x14a   : > { %2535 = vst [vmem:[%s3064_s26 + $0x40] sm:$0xff] %v2411_v33   ;;  %2551 = vst [vmem:[%s3064_s26 + $0xc0] sm:$0xff] %v2491_v34   ;;  %v1475_v39 = vmul.f32 %v3042_v15, %v1074_v37  ;;  %v1507_v40 = vmul.f32 %v3042_v15, %v1202_v38  ;;  %v1609_v45 = vmax.f32 %v1545_v35, 0.0  ;;  %v1641_v46 = vmax.f32 %v1577_v36, 0.0 }
 0x14b   : > { %v1076_v41 = vpop.f32.mrf.mxu0  ;;  %v1204_v42 = vpop.f32.mrf.mxu1 }
 0x14c   : > { %v1546_v43 = vadd.f32 %v3048_v19, %v1475_v39  ;;  %v1578_v44 = vadd.f32 %v3048_v19, %v1507_v40 }
 0x14d   : > { %v1079_v47 = vpop.f32.mrf.mxu0  ;;  %v1207_v48 = vpop.f32.mrf.mxu1 }
 0x14e   : > { %v1610_v49 = vmax.f32 %v1546_v43, 0.0  ;;  %v1642_v50 = vmax.f32 %v1578_v44, 0.0  ;;  %v1476_v51 = vmul.f32 %v3042_v15, %v1079_v47  ;;  %v1508_v52 = vmul.f32 %v3042_v15, %v1207_v48 }
 0x14f   : > { %v1081_v53 = vpop.f32.mrf.mxu0  ;;  %v1209_v54 = vpop.f32.mrf.mxu1 }
 0x150   : > { %v2416_v55 = vpack.c.bf16 %v1610_v49, %v1609_v45  ;;  %v2496_v56 = vpack.c.bf16 %v1642_v50, %v1641_v46  ;;  %v1547_v57 = vadd.f32 %v3048_v19, %v1476_v51  ;;  %v1579_v58 = vadd.f32 %v3048_v19, %v1508_v52 }
 0x151   : > { %v1082_v59 = vpop.f32.mrf.mxu0  ;;  %v1210_v60 = vpop.f32.mrf.mxu1 }
 0x152   : > { %2536 = vst [vmem:[%s3064_s26 + $0x48] sm:$0xff] %v2416_v55   ;;  %2552 = vst [vmem:[%s3064_s26 + $0xc8] sm:$0xff] %v2496_v56   ;;  %v1477_v61 = vmul.f32 %v3042_v15, %v1082_v59  ;;  %v1509_v62 = vmul.f32 %v3042_v15, %v1210_v60  ;;  %v1611_v3 = vmax.f32 %v1547_v57, 0.0  ;;  %v1643_v4 = vmax.f32 %v1579_v58, 0.0 }
 0x153   : > { %v1084_v63 = vpop.f32.mrf.mxu0  ;;  %v1212_v0 = vpop.f32.mrf.mxu1 }
 0x154   : > { %v1548_v1 = vadd.f32 %v3048_v19, %v1477_v61  ;;  %v1580_v2 = vadd.f32 %v3048_v19, %v1509_v62 }
 0x155   : > { %v1087_v5 = vpop.f32.mrf.mxu0  ;;  %v1215_v6 = vpop.f32.mrf.mxu1 }
 0x156   : > { %v1612_v7 = vmax.f32 %v1548_v1, 0.0  ;;  %v1644_v8 = vmax.f32 %v1580_v2, 0.0  ;;  %v1478_v9 = vmul.f32 %v3042_v15, %v1087_v5  ;;  %v1510_v10 = vmul.f32 %v3042_v15, %v1215_v6 }
 0x157   : > { %v1089_v11 = vpop.f32.mrf.mxu0  ;;  %v1217_v12 = vpop.f32.mrf.mxu1 }
 0x158   : > { %v2421_v13 = vpack.c.bf16 %v1612_v7, %v1611_v3  ;;  %v2501_v14 = vpack.c.bf16 %v1644_v8, %v1643_v4  ;;  %v1549_v16 = vadd.f32 %v3048_v19, %v1478_v9  ;;  %v1581_v17 = vadd.f32 %v3048_v19, %v1510_v10 }
 0x159   : > { %v1090_v18 = vpop.f32.mrf.mxu0  ;;  %v1218_v20 = vpop.f32.mrf.mxu1 }
 0x15a   : > { %2537 = vst [vmem:[%s3064_s26 + $0x50] sm:$0xff] %v2421_v13   ;;  %2553 = vst [vmem:[%s3064_s26 + $0xd0] sm:$0xff] %v2501_v14   ;;  %v1479_v21 = vmul.f32 %v3042_v15, %v1090_v18  ;;  %v1511_v22 = vmul.f32 %v3042_v15, %v1218_v20  ;;  %v1613_v27 = vmax.f32 %v1549_v16, 0.0  ;;  %v1645_v28 = vmax.f32 %v1581_v17, 0.0 }
 0x15b   : > { %v1092_v23 = vpop.f32.mrf.mxu0  ;;  %v1220_v24 = vpop.f32.mrf.mxu1 }
 0x15c   : > { %v1550_v25 = vadd.f32 %v3048_v19, %v1479_v21  ;;  %v1582_v26 = vadd.f32 %v3048_v19, %v1511_v22 }
 0x15d   : > { %v1095_v29 = vpop.f32.mrf.mxu0  ;;  %v1223_v30 = vpop.f32.mrf.mxu1 }
 0x15e   : > { %v1614_v31 = vmax.f32 %v1550_v25, 0.0  ;;  %v1646_v32 = vmax.f32 %v1582_v26, 0.0  ;;  %v1480_v33 = vmul.f32 %v3042_v15, %v1095_v29  ;;  %v1512_v34 = vmul.f32 %v3042_v15, %v1223_v30 }
 0x15f   : > { %v1097_v35 = vpop.f32.mrf.mxu0  ;;  %v1225_v36 = vpop.f32.mrf.mxu1 }
 0x160   : > { %v2426_v37 = vpack.c.bf16 %v1614_v31, %v1613_v27  ;;  %v2506_v38 = vpack.c.bf16 %v1646_v32, %v1645_v28  ;;  %v1551_v39 = vadd.f32 %v3048_v19, %v1480_v33  ;;  %v1583_v40 = vadd.f32 %v3048_v19, %v1512_v34 }
 0x161   : > { %v1098_v41 = vpop.f32.mrf.mxu0  ;;  %v1226_v42 = vpop.f32.mrf.mxu1 }
 0x162   : > { %2538 = vst [vmem:[%s3064_s26 + $0x58] sm:$0xff] %v2426_v37   ;;  %2554 = vst [vmem:[%s3064_s26 + $0xd8] sm:$0xff] %v2506_v38   ;;  %v1481_v43 = vmul.f32 %v3042_v15, %v1098_v41  ;;  %v1513_v44 = vmul.f32 %v3042_v15, %v1226_v42  ;;  %v1615_v49 = vmax.f32 %v1551_v39, 0.0  ;;  %v1647_v50 = vmax.f32 %v1583_v40, 0.0 }
 0x163   : > { %v1100_v45 = vpop.f32.mrf.mxu0  ;;  %v1228_v46 = vpop.f32.mrf.mxu1 }
 0x164   : > { %v1552_v47 = vadd.f32 %v3048_v19, %v1481_v43  ;;  %v1584_v48 = vadd.f32 %v3048_v19, %v1513_v44 }
 0x165   : > { %v1103_v51 = vpop.f32.mrf.mxu0  ;;  %v1231_v52 = vpop.f32.mrf.mxu1 }
 0x166   : > { %v1616_v53 = vmax.f32 %v1552_v47, 0.0  ;;  %v1648_v54 = vmax.f32 %v1584_v48, 0.0  ;;  %v1482_v55 = vmul.f32 %v3042_v15, %v1103_v51  ;;  %v1514_v56 = vmul.f32 %v3042_v15, %v1231_v52 }
 0x167   : > { %v1105_v57 = vpop.f32.mrf.mxu0  ;;  %v1233_v58 = vpop.f32.mrf.mxu1 }
 0x168   : > { %v2431_v59 = vpack.c.bf16 %v1616_v53, %v1615_v49  ;;  %v2511_v60 = vpack.c.bf16 %v1648_v54, %v1647_v50  ;;  %v1553_v61 = vadd.f32 %v3048_v19, %v1482_v55  ;;  %v1585_v62 = vadd.f32 %v3048_v19, %v1514_v56 }
 0x169   : > { %v1106_v63 = vpop.f32.mrf.mxu0  ;;  %v1234_v0 = vpop.f32.mrf.mxu1 }
 0x16a   : > { %2539 = vst [vmem:[%s3064_s26 + $0x60] sm:$0xff] %v2431_v59   ;;  %2555 = vst [vmem:[%s3064_s26 + $0xe0] sm:$0xff] %v2511_v60   ;;  %v1483_v1 = vmul.f32 %v3042_v15, %v1106_v63  ;;  %v1515_v2 = vmul.f32 %v3042_v15, %v1234_v0  ;;  %v1617_v7 = vmax.f32 %v1553_v61, 0.0  ;;  %v1649_v8 = vmax.f32 %v1585_v62, 0.0 }
 0x16b   : > { %v1108_v3 = vpop.f32.mrf.mxu0  ;;  %v1236_v4 = vpop.f32.mrf.mxu1 }
 0x16c   : > { %v1554_v5 = vadd.f32 %v3048_v19, %v1483_v1  ;;  %v1586_v6 = vadd.f32 %v3048_v19, %v1515_v2 }
 0x16d   : > { %v1111_v9 = vpop.f32.mrf.mxu0  ;;  %v1239_v10 = vpop.f32.mrf.mxu1 }
 0x16e   : > { %v1618_v11 = vmax.f32 %v1554_v5, 0.0  ;;  %v1650_v12 = vmax.f32 %v1586_v6, 0.0  ;;  %v1484_v13 = vmul.f32 %v3042_v15, %v1111_v9  ;;  %v1516_v14 = vmul.f32 %v3042_v15, %v1239_v10 }
 0x16f   : > { %v1113_v16 = vpop.f32.mrf.mxu0  ;;  %v1241_v17 = vpop.f32.mrf.mxu1 }
 0x170   : > { %v2436_v18 = vpack.c.bf16 %v1618_v11, %v1617_v7  ;;  %v2516_v20 = vpack.c.bf16 %v1650_v12, %v1649_v8  ;;  %v1555_v21 = vadd.f32 %v3048_v19, %v1484_v13  ;;  %v1587_v22 = vadd.f32 %v3048_v19, %v1516_v14 }
 0x171   : > { %v1114_v23 = vpop.f32.mrf.mxu0  ;;  %v1242_v24 = vpop.f32.mrf.mxu1 }
 0x172   : > { %2540 = vst [vmem:[%s3064_s26 + $0x68] sm:$0xff] %v2436_v18   ;;  %2556 = vst [vmem:[%s3064_s26 + $0xe8] sm:$0xff] %v2516_v20   ;;  %v1485_v25 = vmul.f32 %v3042_v15, %v1114_v23  ;;  %v1517_v26 = vmul.f32 %v3042_v15, %v1242_v24  ;;  %v1619_v31 = vmax.f32 %v1555_v21, 0.0  ;;  %v1651_v32 = vmax.f32 %v1587_v22, 0.0 }
 0x173   : > { %v1116_v27 = vpop.f32.mrf.mxu0  ;;  %v1244_v28 = vpop.f32.mrf.mxu1 }
 0x174   : > { %v1556_v29 = vadd.f32 %v3048_v19, %v1485_v25  ;;  %v1588_v30 = vadd.f32 %v3048_v19, %v1517_v26 }
 0x175   : > { %v1119_v33 = vpop.f32.mrf.mxu0  ;;  %v1247_v34 = vpop.f32.mrf.mxu1 }
 0x176   : > { %v1620_v35 = vmax.f32 %v1556_v29, 0.0  ;;  %v1652_v36 = vmax.f32 %v1588_v30, 0.0  ;;  %v1486_v37 = vmul.f32 %v3042_v15, %v1119_v33  ;;  %v1518_v38 = vmul.f32 %v3042_v15, %v1247_v34 }
 0x177   : > { %v1121_v39 = vpop.f32.mrf.mxu0  ;;  %v1249_v40 = vpop.f32.mrf.mxu1 }
 0x178   : > { %v2441_v41 = vpack.c.bf16 %v1620_v35, %v1619_v31  ;;  %v2521_v42 = vpack.c.bf16 %v1652_v36, %v1651_v32  ;;  %v1557_v45 = vadd.f32 %v3048_v19, %v1486_v37  ;;  %v1589_v46 = vadd.f32 %v3048_v19, %v1518_v38 }
 0x179   : > { %v1122_v43 = vpop.f32.mrf.mxu0  ;;  %v1250_v44 = vpop.f32.mrf.mxu1 }
 0x17a   : > { %2541 = vst [vmem:[%s3064_s26 + $0x70] sm:$0xff] %v2441_v41   ;;  %2557 = vst [vmem:[%s3064_s26 + $0xf0] sm:$0xff] %v2521_v42   ;;  %v1487_v47 = vmul.f32 %v3042_v15, %v1122_v43  ;;  %v1519_v48 = vmul.f32 %v3042_v15, %v1250_v44  ;;  %v1621_v53 = vmax.f32 %v1557_v45, 0.0  ;;  %v1653_v54 = vmax.f32 %v1589_v46, 0.0 }
 0x17b   : > { %v1124_v49 = vpop.f32.mrf.mxu0  ;;  %v1252_v50 = vpop.f32.mrf.mxu1 }
 0x17c   : > { %v1558_v51 = vadd.f32 %v3048_v19, %v1487_v47  ;;  %v1590_v52 = vadd.f32 %v3048_v19, %v1519_v48 }
 0x17e   : > { %v1622_v55 = vmax.f32 %v1558_v51, 0.0  ;;  %v1654_v56 = vmax.f32 %v1590_v52, 0.0 }
 0x180   : > { %v2446_v15 = vpack.c.bf16 %v1622_v55, %v1621_v53  ;;  %v2526_v57 = vpack.c.bf16 %v1654_v56, %v1653_v54 }
 0x182   : > { %2542 = vst [vmem:[%s3064_s26 + $0x78] sm:$0xff] %v2446_v15   ;;  %2558 = vst [vmem:[%s3064_s26 + $0xf8] sm:$0xff] %v2526_v57  }
 0x183   : > { %2757 = shalt.err (!%p2754_p5)
}
 0x184   : > { %s2758_s12 = scalar_lea.hbm %s3217_s7, 4096  ;;  %s2762_s22 = scalar_lea.hbm %s3274_s4, 16384 }
 0x185   : > { %p2759_p6 = scmp.ne.s32.totalorder %s3217_s7, %s2758_s12  ;;  %p2763_p10 = scmp.lt.s32.totalorder %s3217_s7, %s3274_s4 }
 0x186   : > { %p2764_p11 = scmp.lt.s32.totalorder %s2762_s22, %s2758_s12 }
 0x187   : > { %p2760_p7 = pnand %p2759_p6, %p2892_p4 }
 0x188   : > { %p2765_p12 = por %p2764_p11, %p2763_p10 }
 0x189   : > { %p2761_p9 = pneg %p2760_p7 }
 0x18b   : > { %p2766_p13 = pnand %p2765_p12, %p2761_p9 }
 0x18d   : > { %2769 = shalt.err (!%p2766_p13)
}
 0x18e   : > { %s2825_s26 = smov 64   ;;  %s2826_s29 = smov 4  }
 0x18f   : > { %2579 = dma.vmem_to_hbm [thread:$0]  (%p2892_p4), %s3219_s30, 4096, %s3217_s7, %s3225_s18, %s2825_s26, %s2825_s26, %s2826_s29  }
 0x190 PF: > { %p2585_p0 = scmp.ge.s32.totalorder %s2820_s20, 2  ;;  %s2005_s5 = sand.u32 1, %s2800_s15  }
 0x191   : > { %s2006_s6 = scalar_lea.sflag [#allocation4], %s2005_s5 }
 0x192   : > { %p2582_p1 = pnand %p2585_p0, %p2899_p8 }
 0x194   : > { %p2583_p2 = pneg %p2582_p1 }
 0x196   : > { %2795 = dma.done.wait (%p2583_p2), %s2006_s6, 4096  }
 0x197   : > { %2797 = vsyncadd (%p2583_p2), %s2006_s6, 4294963200  ;;  %s17_s20 = sadd.s32 1, %s2820_s20   ;;  %s3277_s15 = smov %s2804_s16 }
 0x198   : > { %p14_p3 = scmp.ge.s32.totalorder %s17_s20, 6   ;;  %s3278_s16 = smov %s2808_s17 }
 0x199   : > { %s3279_s17 = smov %s2905_s28  ;;  %s3280_s18 = smov %s2816_s19 }
 0x19a   : > { %s3281_s19 = smov %s3283_s23  ;;  %16 = sbr.rel (!%p14_p3) target bundleno = 4 (0x4), region = 88 }
 0x19f   :  { %2011 = vsyncpa [#allocation4], 1 }
 0x1a0   :  { %2013 = vsyncpa [#allocation4 + $0x1], 1 }

</bundles_post_ra>
